<compile_context>
chip_gen: v6e
topology: v6e:2x2x1
jax: 0.10.0
libtpu: 0.0.40
codegen_flags: <defaults>
</compile_context>

<pallas_src>
import functools

import jax
import jax.numpy as jnp
from jax.experimental import pallas as pl
from jax.experimental.pallas import tpu as pltpu


_STATS_LANES = 256   # packed scalar outputs: lanes [0,128)=rec, [128,256)=kld


def _round_up(a, m):
    return ((a + m - 1) // m) * m


def _vmem_capacity_bytes():
    """Physical VMEM of the attached TPU; conservative 64 MiB fallback."""
    try:
        info = pltpu.get_tpu_info()
        return int(getattr(info, "vmem_capacity_bytes", 64 << 20))
    except Exception:
        return 64 << 20


def _estimate_vmem_bytes(TB, TV, Hp, Tp, mxu_itemsize):
    """VMEM footprint: double-buffered blocks + scratch + phase-1 temporaries
    (f32 logits, exp/max temps, mls) that Mosaic materializes."""
    f32 = 4
    hp_tp = Hp + Tp
    buffered = (TB * TV * mxu_itemsize          # x tile
                + TV * hp_tp * mxu_itemsize     # [Wh | Wtop^T] tile
                + Tp * TV * mxu_itemsize        # Wtop tile
                + TB * Tp * f32                 # noise tile
                + 8 * Hp * f32                  # bh (sublane-padded)
                + Hp * 2 * Tp * f32             # Wmu|Wls
                + 8 * 2 * Tp * f32              # bmu|bls
                + TB * Tp * f32                 # h output tile
                + TB * _STATS_LANES * f32)      # stats output tile
    scratch = (TB * hp_tp                       # [h1 | x@Wtop^T] accumulator
               + 2 * TB * Tp                    # h2 (f32 + MXU-dtype copy)
               + 4 * TB * 128) * f32            # kld/m/s/xsum (lane-padded)
    temps = (3 * TB * TV + TB * 2 * Tp + TB * Hp) * f32
    return 2 * buffered + scratch + temps


def _choose_vocab_tile(V, TB, Hp, Tp, mxu_itemsize, budget):
    """Largest vocab tile fitting the budget. TV == V => weights VMEM-resident
    for the whole grid (one weight DMA total)."""
    def fits(tv):
        return _estimate_vmem_bytes(TB, tv, Hp, Tp, mxu_itemsize) <= budget
    if fits(V):
        return V
    t = (min(V, 8192) // 128) * 128
    while t >= 128:
        if V % t == 0 and fits(t):
            return t
        t -= 128
    return V   # fallback (e.g. V has no suitable divisor)


def _ntm_kernel(x_ref, whcat_ref, bh_ref, wmls_ref, bmls_ref, wtop_ref,
                noise_ref, h_ref, stats_ref,
                hw_acc, h2f_acc, h2m_acc, kld_acc, m_acc, s_acc, xsum_acc):
    p = pl.program_id(1)           # 0: stream x over vocab ; 1: topics / LSE
    v = pl.program_id(2)           # vocab block index
    n_v = pl.num_programs(2)
    Hp = bh_ref.shape[1]           # padded hidden size (lane-aligned)
    Tp = noise_ref.shape[1]        # padded topic size (lane-aligned)

    # -------- phase 0: fused K-reduction  x @ [Wh | Wtop^T]  + row-sum(x) ----
    @pl.when((p == 0) & (v == 0))
    def _():
        hw_acc[...] = jnp.zeros_like(hw_acc)
        xsum_acc[...] = jnp.zeros_like(xsum_acc)

    @pl.when(p == 0)
    def _():
        xt = x_ref[...]
        hw_acc[...] += jnp.dot(xt, whcat_ref[...],
                               preferred_element_type=jnp.float32)
        xsum_acc[...] += jnp.sum(xt.astype(jnp.float32), axis=-1, keepdims=True)

    # -------- phase 1: latent sample + h2 @ Wtop with online log-softmax -----
    @pl.when(p == 1)
    def _():
        @pl.when(v == 0)
        def _():
            # encoder: LeakyReLU(x @ Wh + bh), torch default slope 0.01
            h1 = hw_acc[:, :Hp] + bh_ref[...]
            h1 = jnp.where(h1 > 0, h1, 0.01 * h1)
            # fused mu / log_sigma projection (single (Hp, 2Tp) matmul)
            mls = jnp.dot(h1, wmls_ref[...],
                          preferred_element_type=jnp.float32) + bmls_ref[...]
            mu = mls[:, :Tp]
            ls = mls[:, Tp:]
            kld_acc[...] = -0.5 * jnp.sum(
                1.0 - mu * mu + 2.0 * ls - jnp.exp(2.0 * ls),
                axis=-1, keepdims=True)
            h2 = noise_ref[...] * jnp.exp(ls) + mu   # reparameterized sample
            h2f_acc[...] = h2
            h2m_acc[...] = h2.astype(h2m_acc.dtype)  # cast once for the MXU
            h_ref[...] = h2.astype(h_ref.dtype)      # lane-dense (Tp) output
            m_acc[...] = jnp.full(m_acc.shape, -1e30, dtype=m_acc.dtype)
            s_acc[...] = jnp.zeros_like(s_acc)

        # logits for this vocab tile; f32 accumulation on the MXU
        logits = jnp.dot(h2m_acc[...], wtop_ref[...],
                         preferred_element_type=jnp.float32)      # (TB, TV)
        m_prev = m_acc[...]
        m_new = jnp.maximum(m_prev, jnp.max(logits, axis=-1, keepdims=True))
        s_acc[...] = (jnp.exp(m_prev - m_new) * s_acc[...]
                      + jnp.sum(jnp.exp(logits - m_new), axis=-1, keepdims=True))
        m_acc[...] = m_new

        @pl.when(v == n_v - 1)
        def _():
            # rec = -(sum_v x*(logits - lse)) = lse*sum(x) - h2 . (x @ Wtop^T)
            lse = m_acc[...] + jnp.log(s_acc[...])
            xdot = jnp.sum(h2f_acc[...] * hw_acc[:, Hp:],
                           axis=-1, keepdims=True)
            rec = lse * xsum_acc[...] - xdot
            kld = kld_acc[...]
            half = stats_ref.shape[1] // 2
            lane = jax.lax.broadcasted_iota(jnp.int32, stats_ref.shape, 1)
            stats_ref[...] = jnp.where(
                lane < half,
                jnp.broadcast_to(rec, stats_ref.shape),
                jnp.broadcast_to(kld, stats_ref.shape))


def _pad2(a, rows, cols):
    r, c = a.shape
    return jnp.pad(a, ((0, rows - r), (0, cols - c)))


def ntm_forward(x, params, noise, *, use_bf16=True, batch_tile=None,
                vocab_tile=None):
    """NTM forward pass. Returns a dict mirroring the PyTorch module."""
    B, V = x.shape
    H = params["Wh"].shape[1]
    T = params["Wmu"].shape[1]
    Hp = _round_up(H, 128)
    Tp = _round_up(T, 128)

    mxu_dtype = jnp.bfloat16 if use_bf16 else jnp.float32
    mxu_itemsize = 2 if use_bf16 else 4

    # ---- batch tile: big (amortizes weight streaming), but keep >= 2 batch
    # blocks when B >= 16 so both v7x TensorCores get work.
    if batch_tile is not None:
        TB = max(8, _round_up(batch_tile, 8))
    else:
        TB = max(8, _round_up(B, 8))
        if B >= 16:
            TB = min(TB, _round_up((B + 1) // 2, 8))
        TB = min(TB, 512)
    B_pad = _round_up(B, TB)

    # ---- VMEM budget from the actual chip (v7x: 64 MiB, v5e/v6e: 128 MiB).
    cap = _vmem_capacity_bytes()
    limit_cap = min(int(0.78 * cap), 100 << 20)   # ~50 MiB on v7x, 100 MiB else

    if vocab_tile is not None:
        TV = vocab_tile
    else:
        TV = _choose_vocab_tile(V, TB, Hp, Tp, mxu_itemsize,
                                budget=int(0.9 * limit_cap))
    assert V % TV == 0, "vocab tile must divide the vocab size"
    assert TV == V or TV % 128 == 0, "vocab tile must be lane-aligned"
    n_b, n_v = B_pad // TB, V // TV
    last_v = n_v - 1

    # ---- inputs / weights (padded & pre-transposed, feature axis last) ------
    x_in = x.astype(mxu_dtype)
    noise_in = _pad2(noise.astype(jnp.float32), B, Tp)
    if B_pad != B:
        x_in = jnp.pad(x_in, ((0, B_pad - B), (0, 0)))
        noise_in = jnp.pad(noise_in, ((0, B_pad - B), (0, 0)))

    wh_p = _pad2(params["Wh"], V, Hp)                      # (V, Hp)
    wtopT_p = _pad2(params["Wtop"].T, V, Tp)               # (V, Tp)
    whcat = jnp.concatenate([wh_p, wtopT_p], axis=1).astype(mxu_dtype)
    wtop = _pad2(params["Wtop"], Tp, V).astype(mxu_dtype)  # (Tp, V)
    bh = _pad2(params["bh"], 1, Hp).astype(jnp.float32)
    wmls = jnp.concatenate([_pad2(params["Wmu"], Hp, Tp),
                            _pad2(params["Wls"], Hp, Tp)],
                           axis=1).astype(jnp.float32)      # (Hp, 2Tp)
    bmls = jnp.concatenate([_pad2(params["bmu"], 1, Tp),
                            _pad2(params["bls"], 1, Tp)],
                           axis=1).astype(jnp.float32)      # (1, 2Tp)

    grid = (n_b, 2, n_v)

    # Phase-pinned index maps avoid any re-DMA of x / whcat during phase 1 and
    # let Wtop's first tile prefetch during phase 0.
    in_specs = [
        pl.BlockSpec((TB, TV),
                     lambda b, p, v: (b, v * (1 - p) + last_v * p)),   # x
        pl.BlockSpec((TV, Hp + Tp),
                     lambda b, p, v: (v * (1 - p) + last_v * p, 0)),   # [Wh|WtopT]
        pl.BlockSpec((1, Hp), lambda b, p, v: (0, 0)),                 # bh
        pl.BlockSpec((Hp, 2 * Tp), lambda b, p, v: (0, 0)),            # Wmu|Wls
        pl.BlockSpec((1, 2 * Tp), lambda b, p, v: (0, 0)),             # bmu|bls
        pl.BlockSpec((Tp, TV), lambda b, p, v: (0, v * p)),            # Wtop
        pl.BlockSpec((TB, Tp), lambda b, p, v: (b, 0)),                # noise
    ]
    out_specs = (
        pl.BlockSpec((TB, Tp), lambda b, p, v: (b, 0)),                # h
        pl.BlockSpec((TB, _STATS_LANES), lambda b, p, v: (b, 0)),      # rec|kld
    )
    out_shapes = (
        jax.ShapeDtypeStruct((B_pad, Tp), jnp.float32),
        jax.ShapeDtypeStruct((B_pad, _STATS_LANES), jnp.float32),
    )
    scratch_shapes = [
        pltpu.VMEM((TB, Hp + Tp), jnp.float32),  # [h1 | x @ Wtop^T] accumulator
        pltpu.VMEM((TB, Tp), jnp.float32),       # h2 (f32, for h2 . xw)
        pltpu.VMEM((TB, Tp), mxu_dtype),         # h2 (MXU dtype, cast once)
        pltpu.VMEM((TB, 1), jnp.float32),        # kld
        pltpu.VMEM((TB, 1), jnp.float32),        # running max (online LSE)
        pltpu.VMEM((TB, 1), jnp.float32),        # running sum-exp
        pltpu.VMEM((TB, 1), jnp.float32),        # running sum(x)
    ]

    est = _estimate_vmem_bytes(TB, TV, Hp, Tp, mxu_itemsize)
    vmem_limit = int(min(limit_cap, max(32 << 20, int(1.3 * est))))

    h_full, stats = pl.pallas_call(
        _ntm_kernel,
        out_shape=out_shapes,
        grid_spec=pltpu.PrefetchScalarGridSpec(
            num_scalar_prefetch=0,
            grid=grid,
            in_specs=in_specs,
            out_specs=out_specs,
            scratch_shapes=scratch_shapes),
        compiler_params=pltpu.CompilerParams(
            dimension_semantics=("parallel", "arbitrary", "arbitrary"),
            vmem_limit_bytes=vmem_limit),
    )(x_in, whcat, bh, wmls, bmls, wtop, noise_in)

    rec_loss = stats[:B, 0]
    kld = stats[:B, _STATS_LANES // 2]
    minus_elbo = rec_loss + kld
    h = h_full[:B, :T]
    return {
        "ntm_loss": minus_elbo,
        "minus_elbo": minus_elbo,
        "rec_loss": rec_loss,
        "kld": kld,
        "h": h,
    }


def _xavier_normal(key, fan_out, fan_in):
    # torch.nn.init.xavier_normal_ on a (out, in) weight
    std = (2.0 / (fan_in + fan_out)) ** 0.5
    return std * jax.random.normal(key, (fan_out, fan_in), dtype=jnp.float32)


def init_params(key, vocab_size, hidden_size, topic_size):
    ks = jax.random.split(key, 7)
    # stored pre-transposed for the kernel: (in, out)
    Wh = _xavier_normal(ks[0], hidden_size, vocab_size).T           # (V, H)
    bh = jax.random.normal(ks[1], (1, hidden_size), jnp.float32)
    Wmu = _xavier_normal(ks[2], topic_size, hidden_size).T          # (H, T)
    bmu = jax.random.normal(ks[3], (1, topic_size), jnp.float32)
    Wls = _xavier_normal(ks[4], topic_size, hidden_size).T          # (H, T)
    bls = jax.random.normal(ks[5], (1, topic_size), jnp.float32)
    Wtop = _xavier_normal(ks[6], vocab_size, topic_size).T          # (T, V)
    return {"Wh": Wh, "bh": bh, "Wmu": Wmu, "bmu": bmu,
            "Wls": Wls, "bls": bls, "Wtop": Wtop}


def _reference(x, p, noise, matmul_dtype=jnp.float32):
    """Pure-JAX reference; matmul operands are rounded to matmul_dtype so the
    bf16 kernel path can be checked apples-to-apples (math stays f32)."""
    c = lambda a: a.astype(matmul_dtype).astype(jnp.float32)
    h1 = c(x) @ c(p["Wh"]) + p["bh"]
    h1 = jnp.where(h1 > 0, h1, 0.01 * h1)
    mu = h1 @ p["Wmu"] + p["bmu"]
    ls = h1 @ p["Wls"] + p["bls"]
    kld = -0.5 * jnp.sum(1 - mu ** 2 + 2 * ls - jnp.exp(2 * ls), axis=-1)
    h2 = noise * jnp.exp(ls) + mu
    log_prob = jax.nn.log_softmax(c(h2) @ c(p["Wtop"]), axis=-1)
    rec = -jnp.sum(log_prob * c(x), axis=-1)
    return rec + kld, rec, kld, h2


if __name__ == "__main__":
    B, V, H, T = 8, 256, 64, 32   # batch, vocab, hidden, topics

    key = jax.random.PRNGKey(0)
    k_param, k_x, k_noise = jax.random.split(key, 3)

    params = init_params(k_param, vocab_size=V, hidden_size=H, topic_size=T)
    # synthetic bag-of-words counts (non-negative small integers)
    x = jax.random.poisson(k_x, 1.0, (B, V)).astype(jnp.float32)
    # eps ~ N(0, 1), mirrors torch.zeros_like(mu).normal_()
    noise = jax.random.normal(k_noise, (B, T), dtype=jnp.float32)

    # --- f32 path, vocab tiled into 2 blocks (exercises streaming + online LSE)
    fwd_f32 = jax.jit(functools.partial(ntm_forward, use_bf16=False,
                                        vocab_tile=128))
    out = fwd_f32(x, params, noise)
    jax.block_until_ready(out)

    ref_elbo, ref_rec, ref_kld, ref_h = _reference(x, params, noise)
    assert jnp.allclose(out["minus_elbo"], ref_elbo, rtol=5e-4, atol=5e-2)
    assert jnp.allclose(out["rec_loss"], ref_rec, rtol=5e-4, atol=5e-2)
    assert jnp.allclose(out["kld"], ref_kld, rtol=5e-4, atol=5e-2)
    assert jnp.allclose(out["h"], ref_h, rtol=1e-4, atol=1e-3)

    # --- bf16-weight path (default tiling; weights VMEM-resident here) -------
    fwd_bf16 = jax.jit(functools.partial(ntm_forward, use_bf16=True))
    out_bf = fwd_bf16(x, params, noise)
    jax.block_until_ready(out_bf)

    rb_elbo, rb_rec, rb_kld, rb_h = _reference(x, params, noise,
                                               matmul_dtype=jnp.bfloat16)
    assert jnp.allclose(out_bf["minus_elbo"], rb_elbo, rtol=1e-3, atol=1e-1)
    assert jnp.allclose(out_bf["rec_loss"], rb_rec, rtol=1e-3, atol=1e-1)
    assert jnp.allclose(out_bf["kld"], rb_kld, rtol=1e-3, atol=1e-1)
    assert jnp.allclose(out_bf["h"], rb_h, rtol=1e-3, atol=1e-3)

    print("KERNEL_OK")
</pallas_src>

<mosaic_0001>
module attributes {stable_mosaic.version = 11 : i64} {
  func.func @_ntm_kernel(%arg0: i32, %arg1: i32, %arg2: i32, %arg3: memref<8x128xf32, #tpu.memory_space<vmem>>, %arg4: memref<128x256xf32, #tpu.memory_space<vmem>>, %arg5: memref<1x128xf32, #tpu.memory_space<vmem>>, %arg6: memref<128x256xf32, #tpu.memory_space<vmem>>, %arg7: memref<1x256xf32, #tpu.memory_space<vmem>>, %arg8: memref<128x128xf32, #tpu.memory_space<vmem>>, %arg9: memref<8x128xf32, #tpu.memory_space<vmem>>, %arg10: memref<8x128xf32, #tpu.memory_space<vmem>>, %arg11: memref<8x256xf32, #tpu.memory_space<vmem>>, %arg12: memref<8x256xf32, #tpu.memory_space<vmem>>, %arg13: memref<8x128xf32, #tpu.memory_space<vmem>>, %arg14: memref<8x128xf32, #tpu.memory_space<vmem>>, %arg15: memref<8x1xf32, #tpu.memory_space<vmem>>, %arg16: memref<8x1xf32, #tpu.memory_space<vmem>>, %arg17: memref<8x1xf32, #tpu.memory_space<vmem>>, %arg18: memref<8x1xf32, #tpu.memory_space<vmem>>) attributes {dimension_semantics = [#tpu.dimension_semantics<parallel>, #tpu.dimension_semantics<arbitrary>, #tpu.dimension_semantics<arbitrary>], iteration_bounds = array<i64: 1, 2, 2>, scalar_prefetch = 0 : i64, scratch_operands = 7 : i64, tpu.core_type = #tpu.core_type<tc>, window_params = [{transform_indices = @transform_0, window_bounds = array<i64: 8, 128>}, {transform_indices = @transform_1, window_bounds = array<i64: 128, 256>}, {pipeline_mode = #tpu.pipeline_mode<synchronous>, transform_indices = @transform_2, window_bounds = array<i64: 1, 128>}, {pipeline_mode = #tpu.pipeline_mode<synchronous>, transform_indices = @transform_3, window_bounds = array<i64: 128, 256>}, {pipeline_mode = #tpu.pipeline_mode<synchronous>, transform_indices = @transform_4, window_bounds = array<i64: 1, 256>}, {transform_indices = @transform_5, window_bounds = array<i64: 128, 128>}, {transform_indices = @transform_6, window_bounds = array<i64: 8, 128>}, {transform_indices = @transform_7, window_bounds = array<i64: 8, 128>}, {transform_indices = @transform_8, window_bounds = array<i64: 8, 256>}]} {
    %c0_i32 = arith.constant 0 : i32
    %0 = arith.cmpi eq, %arg1, %c0_i32 : i32
    %c0_i32_0 = arith.constant 0 : i32
    %1 = arith.cmpi eq, %arg2, %c0_i32_0 : i32
    %2 = arith.andi %0, %1 : i1
    %3 = arith.extui %2 : i1 to i32
    %c0_i32_1 = arith.constant 0 : i32
    %4 = arith.cmpi ne, %3, %c0_i32_1 : i32
    scf.if %4 {
      %cst = arith.constant 0.000000e+00 : f32
      %11 = vector.broadcast %cst : f32 to vector<8x256xf32>
      %c0 = arith.constant 0 : index
      %c0_5 = arith.constant 0 : index
      %12 = vector.load %arg12[%c0, %c0_5] : memref<8x256xf32, #tpu.memory_space<vmem>>, vector<8x256xf32>
      tpu.vector_store %arg12[%c0, %c0_5], %11 {strides = array<i32>} : memref<8x256xf32, #tpu.memory_space<vmem>>, vector<8x256xf32>,
      %cst_6 = arith.constant 0.000000e+00 : f32
      %13 = vector.broadcast %cst_6 : f32 to vector<8x1xf32>
      %c0_7 = arith.constant 0 : index
      %c0_8 = arith.constant 0 : index
      %14 = vector.load %arg18[%c0_7, %c0_8] : memref<8x1xf32, #tpu.memory_space<vmem>>, vector<8x1xf32>
      tpu.vector_store %arg18[%c0_7, %c0_8], %13 {strides = array<i32>} : memref<8x1xf32, #tpu.memory_space<vmem>>, vector<8x1xf32>,
    } else {
    }
    %c0_i32_2 = arith.constant 0 : i32
    %5 = arith.cmpi eq, %arg1, %c0_i32_2 : i32
    %6 = arith.extui %5 : i1 to i32
    %c0_i32_3 = arith.constant 0 : i32
    %7 = arith.cmpi ne, %6, %c0_i32_3 : i32
    scf.if %7 {
      %c0 = arith.constant 0 : index
      %c0_5 = arith.constant 0 : index
      %11 = vector.load %arg3[%c0, %c0_5] : memref<8x128xf32, #tpu.memory_space<vmem>>, vector<8x128xf32>
      %c0_6 = arith.constant 0 : index
      %c0_7 = arith.constant 0 : index
      %12 = vector.load %arg12[%c0_6, %c0_7] : memref<8x256xf32, #tpu.memory_space<vmem>>, vector<8x256xf32>
      %c0_8 = arith.constant 0 : index
      %c0_9 = arith.constant 0 : index
      %13 = vector.load %arg4[%c0_8, %c0_9] : memref<128x256xf32, #tpu.memory_space<vmem>>, vector<128x256xf32>
      %cst = arith.constant dense<0.000000e+00> : vector<8x256xf32>
      %14 = tpu.matmul %11, %13, %cst {dimension_numbers = #tpu.dot_dimension_numbers<[1], [0], [0], [1], [0, 0, 1, 1], [], []>} : vector<8x128xf32>, vector<128x256xf32>, vector<8x256xf32> -> vector<8x256xf32>
      %15 = arith.addf %12, %14 : vector<8x256xf32>
      %c0_10 = arith.constant 0 : index
      %c0_11 = arith.constant 0 : index
      %16 = vector.load %arg12[%c0_10, %c0_11] : memref<8x256xf32, #tpu.memory_space<vmem>>, vector<8x256xf32>
      tpu.vector_store %arg12[%c0_10, %c0_11], %15 {strides = array<i32>} : memref<8x256xf32, #tpu.memory_space<vmem>>, vector<8x256xf32>,
      %c0_12 = arith.constant 0 : index
      %c0_13 = arith.constant 0 : index
      %17 = vector.load %arg18[%c0_12, %c0_13] : memref<8x1xf32, #tpu.memory_space<vmem>>, vector<8x1xf32>
      %cst_14 = arith.constant dense<0.000000e+00> : vector<8xf32>
      %18 = vector.multi_reduction <add>, %11, %cst_14 [1] : vector<8x128xf32> to vector<8xf32>
      %19 = vector.shape_cast %18 : vector<8xf32> to vector<8x1xf32>
      %20 = arith.addf %17, %19 : vector<8x1xf32>
      %c0_15 = arith.constant 0 : index
      %c0_16 = arith.constant 0 : index
      %21 = vector.load %arg18[%c0_15, %c0_16] : memref<8x1xf32, #tpu.memory_space<vmem>>, vector<8x1xf32>
      tpu.vector_store %arg18[%c0_15, %c0_16], %20 {strides = array<i32>} : memref<8x1xf32, #tpu.memory_space<vmem>>, vector<8x1xf32>,
    } else {
    }
    %c1_i32 = arith.constant 1 : i32
    %8 = arith.cmpi eq, %arg1, %c1_i32 : i32
    %9 = arith.extui %8 : i1 to i32
    %c0_i32_4 = arith.constant 0 : i32
    %10 = arith.cmpi ne, %9, %c0_i32_4 : i32
    scf.if %10 {
      %c0_i32_5 = arith.constant 0 : i32
      %11 = arith.cmpi eq, %arg2, %c0_i32_5 : i32
      %12 = arith.extui %11 : i1 to i32
      %c0_i32_6 = arith.constant 0 : i32
      %13 = arith.cmpi ne, %12, %c0_i32_6 : i32
      scf.if %13 {
        %c0_22 = arith.constant 0 : index
        %c0_23 = arith.constant 0 : index
        %36 = vector.load %arg12[%c0_22, %c0_23] : memref<8x256xf32, #tpu.memory_space<vmem>>, vector<8x128xf32>
        %c0_24 = arith.constant 0 : index
        %c0_25 = arith.constant 0 : index
        %37 = vector.load %arg5[%c0_24, %c0_25] : memref<1x128xf32, #tpu.memory_space<vmem>>, vector<1x128xf32>
        %38 = vector.broadcast %37 : vector<1x128xf32> to vector<8x128xf32>
        %39 = arith.addf %36, %38 : vector<8x128xf32>
        %cst_26 = arith.constant 0.000000e+00 : f32
        %40 = vector.broadcast %cst_26 : f32 to vector<8x128xf32>
        %41 = arith.cmpf ogt, %39, %40 : vector<8x128xf32>
        %cst_27 = arith.constant 0.00999999977 : f32
        %42 = vector.broadcast %cst_27 : f32 to vector<8x128xf32>
        %43 = arith.mulf %42, %39 : vector<8x128xf32>
        %44 = arith.select %41, %39, %43 : vector<8x128xi1>, vector<8x128xf32>
        %c0_28 = arith.constant 0 : index
        %c0_29 = arith.constant 0 : index
        %45 = vector.load %arg6[%c0_28, %c0_29] : memref<128x256xf32, #tpu.memory_space<vmem>>, vector<128x256xf32>
        %cst_30 = arith.constant dense<0.000000e+00> : vector<8x256xf32>
        %46 = tpu.matmul %44, %45, %cst_30 {dimension_numbers = #tpu.dot_dimension_numbers<[1], [0], [0], [1], [0, 0, 1, 1], [], []>} : vector<8x128xf32>, vector<128x256xf32>, vector<8x256xf32> -> vector<8x256xf32>
        %c0_31 = arith.constant 0 : index
        %c0_32 = arith.constant 0 : index
        %47 = vector.load %arg7[%c0_31, %c0_32] : memref<1x256xf32, #tpu.memory_space<vmem>>, vector<1x256xf32>
        %48 = vector.broadcast %47 : vector<1x256xf32> to vector<8x256xf32>
        %49 = arith.addf %46, %48 : vector<8x256xf32>
        %50 = vector.extract_strided_slice %49 {offsets = [0, 0], sizes = [8, 128], strides = [1, 1]} : vector<8x256xf32> to vector<8x128xf32>
        %51 = vector.extract_strided_slice %49 {offsets = [0, 128], sizes = [8, 128], strides = [1, 1]} : vector<8x256xf32> to vector<8x128xf32>
        %52 = arith.mulf %50, %50 : vector<8x128xf32>
        %cst_33 = arith.constant 1.000000e+00 : f32
        %53 = vector.broadcast %cst_33 : f32 to vector<8x128xf32>
        %54 = arith.subf %53, %52 : vector<8x128xf32>
        %cst_34 = arith.constant 2.000000e+00 : f32
        %55 = vector.broadcast %cst_34 : f32 to vector<8x128xf32>
        %56 = arith.mulf %55, %51 : vector<8x128xf32>
        %57 = arith.addf %54, %56 : vector<8x128xf32>
        %cst_35 = arith.constant 2.000000e+00 : f32
        %58 = vector.broadcast %cst_35 : f32 to vector<8x128xf32>
        %59 = arith.mulf %58, %51 : vector<8x128xf32>
        %60 = math.exp %59 : vector<8x128xf32>
        %61 = arith.subf %57, %60 : vector<8x128xf32>
        %cst_36 = arith.constant dense<0.000000e+00> : vector<8xf32>
        %62 = vector.multi_reduction <add>, %61, %cst_36 [1] : vector<8x128xf32> to vector<8xf32>
        %63 = vector.shape_cast %62 : vector<8xf32> to vector<8x1xf32>
        %cst_37 = arith.constant -5.000000e-01 : f32
        %64 = vector.broadcast %cst_37 : f32 to vector<8x1xf32>
        %65 = arith.mulf %64, %63 : vector<8x1xf32>
        %c0_38 = arith.constant 0 : index
        %c0_39 = arith.constant 0 : index
        %66 = vector.load %arg15[%c0_38, %c0_39] : memref<8x1xf32, #tpu.memory_space<vmem>>, vector<8x1xf32>
        tpu.vector_store %arg15[%c0_38, %c0_39], %65 {strides = array<i32>} : memref<8x1xf32, #tpu.memory_space<vmem>>, vector<8x1xf32>,
        %c0_40 = arith.constant 0 : index
        %c0_41 = arith.constant 0 : index
        %67 = vector.load %arg9[%c0_40, %c0_41] : memref<8x128xf32, #tpu.memory_space<vmem>>, vector<8x128xf32>
        %68 = math.exp %51 : vector<8x128xf32>
        %69 = arith.mulf %67, %68 : vector<8x128xf32>
        %70 = arith.addf %69, %50 : vector<8x128xf32>
        %c0_42 = arith.constant 0 : index
        %c0_43 = arith.constant 0 : index
        %71 = vector.load %arg13[%c0_42, %c0_43] : memref<8x128xf32, #tpu.memory_space<vmem>>, vector<8x128xf32>
        tpu.vector_store %arg13[%c0_42, %c0_43], %70 {strides = array<i32>} : memref<8x128xf32, #tpu.memory_space<vmem>>, vector<8x128xf32>,
        %c0_44 = arith.constant 0 : index
        %c0_45 = arith.constant 0 : index
        %72 = vector.load %arg14[%c0_44, %c0_45] : memref<8x128xf32, #tpu.memory_space<vmem>>, vector<8x128xf32>
        tpu.vector_store %arg14[%c0_44, %c0_45], %70 {strides = array<i32>} : memref<8x128xf32, #tpu.memory_space<vmem>>, vector<8x128xf32>,
        %c0_46 = arith.constant 0 : index
        %c0_47 = arith.constant 0 : index
        %73 = vector.load %arg10[%c0_46, %c0_47] : memref<8x128xf32, #tpu.memory_space<vmem>>, vector<8x128xf32>
        tpu.vector_store %arg10[%c0_46, %c0_47], %70 {strides = array<i32>} : memref<8x128xf32, #tpu.memory_space<vmem>>, vector<8x128xf32>,
        %cst_48 = arith.constant -1.000000e+30 : f32
        %74 = vector.broadcast %cst_48 : f32 to vector<8x1xf32>
        %c0_49 = arith.constant 0 : index
        %c0_50 = arith.constant 0 : index
        %75 = vector.load %arg16[%c0_49, %c0_50] : memref<8x1xf32, #tpu.memory_space<vmem>>, vector<8x1xf32>
        tpu.vector_store %arg16[%c0_49, %c0_50], %74 {strides = array<i32>} : memref<8x1xf32, #tpu.memory_space<vmem>>, vector<8x1xf32>,
        %cst_51 = arith.constant 0.000000e+00 : f32
        %76 = vector.broadcast %cst_51 : f32 to vector<8x1xf32>
        %c0_52 = arith.constant 0 : index
        %c0_53 = arith.constant 0 : index
        %77 = vector.load %arg17[%c0_52, %c0_53] : memref<8x1xf32, #tpu.memory_space<vmem>>, vector<8x1xf32>
        tpu.vector_store %arg17[%c0_52, %c0_53], %76 {strides = array<i32>} : memref<8x1xf32, #tpu.memory_space<vmem>>, vector<8x1xf32>,
      } else {
      }
      %c0 = arith.constant 0 : index
      %c0_7 = arith.constant 0 : index
      %14 = vector.load %arg14[%c0, %c0_7] : memref<8x128xf32, #tpu.memory_space<vmem>>, vector<8x128xf32>
      %c0_8 = arith.constant 0 : index
      %c0_9 = arith.constant 0 : index
      %15 = vector.load %arg8[%c0_8, %c0_9] : memref<128x128xf32, #tpu.memory_space<vmem>>, vector<128x128xf32>
      %cst = arith.constant dense<0.000000e+00> : vector<8x128xf32>
      %16 = tpu.matmul %14, %15, %cst {dimension_numbers = #tpu.dot_dimension_numbers<[1], [0], [0], [1], [0, 0, 1, 1], [], []>} : vector<8x128xf32>, vector<128x128xf32>, vector<8x128xf32> -> vector<8x128xf32>
      %c0_10 = arith.constant 0 : index
      %c0_11 = arith.constant 0 : index
      %17 = vector.load %arg16[%c0_10, %c0_11] : memref<8x1xf32, #tpu.memory_space<vmem>>, vector<8x1xf32>
      %cst_12 = arith.constant dense<0xFF800000> : vector<8xf32>
      %18 = vector.multi_reduction <maximumf>, %16, %cst_12 [1] : vector<8x128xf32> to vector<8xf32>
      %19 = vector.shape_cast %18 : vector<8xf32> to vector<8x1xf32>
      %20 = arith.maximumf %17, %19 : vector<8x1xf32>
      %21 = arith.subf %17, %20 : vector<8x1xf32>
      %22 = math.exp %21 : vector<8x1xf32>
      %c0_13 = arith.constant 0 : index
      %c0_14 = arith.constant 0 : index
      %23 = vector.load %arg17[%c0_13, %c0_14] : memref<8x1xf32, #tpu.memory_space<vmem>>, vector<8x1xf32>
      %24 = arith.mulf %22, %23 : vector<8x1xf32>
      %25 = vector.broadcast %20 : vector<8x1xf32> to vector<8x128xf32>
      %26 = arith.subf %16, %25 : vector<8x128xf32>
      %27 = math.exp %26 : vector<8x128xf32>
      %cst_15 = arith.constant dense<0.000000e+00> : vector<8xf32>
      %28 = vector.multi_reduction <add>, %27, %cst_15 [1] : vector<8x128xf32> to vector<8xf32>
      %29 = vector.shape_cast %28 : vector<8xf32> to vector<8x1xf32>
      %30 = arith.addf %24, %29 : vector<8x1xf32>
      %c0_16 = arith.constant 0 : index
      %c0_17 = arith.constant 0 : index
      %31 = vector.load %arg17[%c0_16, %c0_17] : memref<8x1xf32, #tpu.memory_space<vmem>>, vector<8x1xf32>
      tpu.vector_store %arg17[%c0_16, %c0_17], %30 {strides = array<i32>} : memref<8x1xf32, #tpu.memory_space<vmem>>, vector<8x1xf32>,
      %c0_18 = arith.constant 0 : index
      %c0_19 = arith.constant 0 : index
      %32 = vector.load %arg16[%c0_18, %c0_19] : memref<8x1xf32, #tpu.memory_space<vmem>>, vector<8x1xf32>
      tpu.vector_store %arg16[%c0_18, %c0_19], %20 {strides = array<i32>} : memref<8x1xf32, #tpu.memory_space<vmem>>, vector<8x1xf32>,
      %c1_i32_20 = arith.constant 1 : i32
      %33 = arith.cmpi eq, %arg2, %c1_i32_20 : i32
      %34 = arith.extui %33 : i1 to i32
      %c0_i32_21 = arith.constant 0 : i32
      %35 = arith.cmpi ne, %34, %c0_i32_21 : i32
      scf.if %35 {
        %c0_22 = arith.constant 0 : index
        %c0_23 = arith.constant 0 : index
        %36 = vector.load %arg16[%c0_22, %c0_23] : memref<8x1xf32, #tpu.memory_space<vmem>>, vector<8x1xf32>
        %c0_24 = arith.constant 0 : index
        %c0_25 = arith.constant 0 : index
        %37 = vector.load %arg17[%c0_24, %c0_25] : memref<8x1xf32, #tpu.memory_space<vmem>>, vector<8x1xf32>
        %38 = math.log %37 : vector<8x1xf32>
        %39 = arith.addf %36, %38 : vector<8x1xf32>
        %c0_26 = arith.constant 0 : index
        %c0_27 = arith.constant 0 : index
        %40 = vector.load %arg13[%c0_26, %c0_27] : memref<8x128xf32, #tpu.memory_space<vmem>>, vector<8x128xf32>
        %c0_28 = arith.constant 0 : index
        %c128 = arith.constant 128 : index
        %41 = vector.load %arg12[%c0_28, %c128] : memref<8x256xf32, #tpu.memory_space<vmem>>, vector<8x128xf32>
        %42 = arith.mulf %40, %41 : vector<8x128xf32>
        %cst_29 = arith.constant dense<0.000000e+00> : vector<8xf32>
        %43 = vector.multi_reduction <add>, %42, %cst_29 [1] : vector<8x128xf32> to vector<8xf32>
        %44 = vector.shape_cast %43 : vector<8xf32> to vector<8x1xf32>
        %c0_30 = arith.constant 0 : index
        %c0_31 = arith.constant 0 : index
        %45 = vector.load %arg18[%c0_30, %c0_31] : memref<8x1xf32, #tpu.memory_space<vmem>>, vector<8x1xf32>
        %46 = arith.mulf %39, %45 : vector<8x1xf32>
        %47 = arith.subf %46, %44 : vector<8x1xf32>
        %c0_32 = arith.constant 0 : index
        %c0_33 = arith.constant 0 : index
        %48 = vector.load %arg15[%c0_32, %c0_33] : memref<8x1xf32, #tpu.memory_space<vmem>>, vector<8x1xf32>
        %49 = tpu.iota {dimensions = array<i32: 1>} : vector<8x256xi32>
        %c128_i32 = arith.constant 128 : i32
        %50 = vector.broadcast %c128_i32 : i32 to vector<8x256xi32>
        %51 = arith.cmpi slt, %49, %50 : vector<8x256xi32>
        %52 = vector.shape_cast %47 : vector<8x1xf32> to vector<8x1xf32>
        %53 = vector.broadcast %52 : vector<8x1xf32> to vector<8x256xf32>
        %54 = vector.shape_cast %48 : vector<8x1xf32> to vector<8x1xf32>
        %55 = vector.broadcast %54 : vector<8x1xf32> to vector<8x256xf32>
        %56 = arith.select %51, %53, %55 : vector<8x256xi1>, vector<8x256xf32>
        %c0_34 = arith.constant 0 : index
        %c0_35 = arith.constant 0 : index
        %57 = vector.load %arg11[%c0_34, %c0_35] : memref<8x256xf32, #tpu.memory_space<vmem>>, vector<8x256xf32>
        tpu.vector_store %arg11[%c0_34, %c0_35], %56 {strides = array<i32>} : memref<8x256xf32, #tpu.memory_space<vmem>>, vector<8x256xf32>,
      } else {
      }
    } else {
    }
    return
  }
  func.func @transform_0(%arg0: i32, %arg1: i32, %arg2: i32) -> (i32, i32) {
    %c1_i32 = arith.constant 1 : i32
    %0 = arith.subi %c1_i32, %arg1 : i32
    %1 = arith.muli %arg2, %0 : i32
    %c1_i32_0 = arith.constant 1 : i32
    %2 = arith.muli %c1_i32_0, %arg1 : i32
    %3 = arith.addi %1, %2 : i32
    %c0_i32 = arith.constant 0 : i32
    return %arg0, %3 : i32, i32
  }
  func.func @transform_1(%arg0: i32, %arg1: i32, %arg2: i32) -> (i32, i32) {
    %c1_i32 = arith.constant 1 : i32
    %0 = arith.subi %c1_i32, %arg1 : i32
    %1 = arith.muli %arg2, %0 : i32
    %c1_i32_0 = arith.constant 1 : i32
    %2 = arith.muli %c1_i32_0, %arg1 : i32
    %3 = arith.addi %1, %2 : i32
    %c0_i32 = arith.constant 0 : i32
    %c0_i32_1 = arith.constant 0 : i32
    return %3, %c0_i32 : i32, i32
  }
  func.func @transform_2(%arg0: i32, %arg1: i32, %arg2: i32) -> (i32, i32) {
    %c0_i32 = arith.constant 0 : i32
    %c0_i32_0 = arith.constant 0 : i32
    %c0_i32_1 = arith.constant 0 : i32
    return %c0_i32, %c0_i32_0 : i32, i32
  }
  func.func @transform_3(%arg0: i32, %arg1: i32, %arg2: i32) -> (i32, i32) {
    %c0_i32 = arith.constant 0 : i32
    %c0_i32_0 = arith.constant 0 : i32
    %c0_i32_1 = arith.constant 0 : i32
    return %c0_i32, %c0_i32_0 : i32, i32
  }
  func.func @transform_4(%arg0: i32, %arg1: i32, %arg2: i32) -> (i32, i32) {
    %c0_i32 = arith.constant 0 : i32
    %c0_i32_0 = arith.constant 0 : i32
    %c0_i32_1 = arith.constant 0 : i32
    return %c0_i32, %c0_i32_0 : i32, i32
  }
  func.func @transform_5(%arg0: i32, %arg1: i32, %arg2: i32) -> (i32, i32) {
    %0 = arith.muli %arg2, %arg1 : i32
    %c0_i32 = arith.constant 0 : i32
    %c0_i32_0 = arith.constant 0 : i32
    return %c0_i32, %0 : i32, i32
  }
  func.func @transform_6(%arg0: i32, %arg1: i32, %arg2: i32) -> (i32, i32) {
    %c0_i32 = arith.constant 0 : i32
    %c0_i32_0 = arith.constant 0 : i32
    return %arg0, %c0_i32 : i32, i32
  }
  func.func @transform_7(%arg0: i32, %arg1: i32, %arg2: i32) -> (i32, i32) {
    %c0_i32 = arith.constant 0 : i32
    %c0_i32_0 = arith.constant 0 : i32
    return %arg0, %c0_i32 : i32, i32
  }
  func.func @transform_8(%arg0: i32, %arg1: i32, %arg2: i32) -> (i32, i32) {
    %c0_i32 = arith.constant 0 : i32
    %c0_i32_0 = arith.constant 0 : i32
    return %arg0, %c0_i32 : i32, i32
  }
}

</mosaic_0001>

<bundles_post_ra>
// kernel: ntm_forward.1
= control target key start
LH: loop header
LB: loop body
LE: loop exit
PB: predicated region body
PF: predicated region fallthrough
CT: control target
= control target key end

     0   :  { %14 = vsyncpa [#allocation11], 0  ;;  %s1418_s27 = smov 0   ;;  %s1420_s28 = smov 0   ;;  %s1722_s0 = inlined_call_operand.vmem [shape: f32[8,256], index: 0, kind: input, shape index: {}]   ;;  %s1723_s1 = inlined_call_operand.vmem [shape: f32[256,256], index: 1, kind: input, shape index: {}]   ;;  %s1724_s2 = inlined_call_operand.vmem [shape: f32[1,128], index: 2, kind: input, shape index: {}]   ;;  %s1725_s3 = inlined_call_operand.vmem [shape: f32[128,256], index: 3, kind: input, shape index: {}]   ;;  %s1726_s4 = inlined_call_operand.vmem [shape: f32[1,256], index: 4, kind: input, shape index: {}]   ;;  %s1727_s5 = inlined_call_operand.vmem [shape: f32[128,256], index: 5, kind: input, shape index: {}]   ;;  %s1728_s6 = inlined_call_operand.vmem [shape: f32[8,128], index: 6, kind: input, shape index: {}]   ;;  %s1729_s7 = inlined_call_operand.hbm [shape: f32[8,128], index: 7, kind: output, shape index: {0}]   ;;  %s1730_s8 = inlined_call_operand.vmem [shape: f32[8,256], index: 8, kind: output, shape index: {1}]  }
   0x1   :  { %s1422_s29 = smov 0   ;;  %s1424_s30 = smov 0  }
   0x2   :  { %s1426_s9 = smov 0   ;;  %s1428_s10 = smov 0  }
   0x3   :  { %s1430_s11 = smov 0  }
   0x4 LB: > { %s32_s13 = sadd.s32 1, %s1354_s9  ;;  %s35_s14 = sadd.s32 1, %s1358_s10  ;;  %s1362_s11 = sphi %s1430_s11, %s20_s11   ;;  %s1358_s10 = sphi %s1428_s10, %s1738_s10   ;;  %s1354_s9 = sphi %s1426_s9, %s1737_s9   ;;  %s1350_s30 = sphi %s1424_s30, %s1736_s30   ;;  %s1346_s29 = sphi %s1422_s29, %s1735_s29   ;;  %s1342_s28 = sphi %s1420_s28, %s1734_s28   ;;  %s1338_s27 = sphi %s1418_s27, %s1733_s27  }
   0x5   : > { %p33_p0 = scmp.ge.s32.totalorder %s32_s13, 2  ;;  %p184_p1 = scmp.ne.s32.totalorder %s1342_s28, %s1338_s27 }
   0x6   : > { %p185_p2 = scmp.eq.s32.totalorder %s1362_s11, 0  ;;  %s172_s15 = smul.u32 %s1354_s9, %s1358_s10 }
   0x7   : > { %s1740_s13 = smov (%p33_p0, %s32_s13), 0  ;;  %s1742_s14 = smov (!%p33_p0, %s35_s14), %s1358_s10 }
   0x8   : > { %p37_p3 = scmp.ge.s32.totalorder %s1742_s14, 2  ;;  %p186_p4 = por %p185_p2, %p184_p1 }
   0x9   : > { %s177_s18 = sadd.s32 1, %s1342_s28  ;;  %p1124_p6 = scmp.ge.s32.totalorder %s1362_s11, 4 }
   0xa   : > { %s1744_s14 = smov (%p37_p3, %s1742_s14), 0 }
   0xb   : > { %s173_s16 = smul.u32 %s1744_s14, %s1740_s13 }
   0xc   : > { %304 = sbr.rel (%p1124_p6) target bundleno = 29 (0x1d), region = 32 }
   0xd   : > { %s174_s17 = ssub.s32 %s172_s15, %s173_s16 }
   0xe   : > { %p175_p5 = scmp.eq.s32.totalorder %s174_s17, 0 }
  0x10   : > { %s1470_s19 = scalar_select %p175_p5, %s1342_s28, %s177_s18  }
  0x11   : > { %340 = sbr.rel (!%p186_p4) target bundleno = 29 (0x1d), region = 44  ;;  %s342_s20 = sand.u32 (%p186_p4), 1, %s1342_s28  }
  0x12   : > { %s1126_s21 = sshll.u32 (%p186_p4), %s172_s15, 3  ;;  %s1125_s22 = sshll.u32 (%p186_p4), %s342_s20, 7 }
  0x13   : > { %s1477_s25 = scalar_lea.vmem (%p186_p4), %s1727_s5, %s1126_s21  ;;  %s344_s26 = scalar_lea.vmem (%p186_p4), [#allocation9], %s1125_s22 }
  0x14   : > { %v406_v0 = vld [vmem:[%s1477_s25] sm:$0xff] (%p186_p4)  ;;  %v408_v1 = vld [vmem:[%s1477_s25 + $0x10] sm:$0xff] (%p186_p4) }
  0x15   : > { %v410_v2 = vld [vmem:[%s1477_s25 + $0x20] sm:$0xff] (%p186_p4)  ;;  %407 = vst [vmem:[%s344_s26] sm:$0xff] (%p186_p4), %v406_v0  ;;  %409 = vst [vmem:[%s344_s26 + $0x8] sm:$0xff] (%p186_p4), %v408_v1  ;;  %v412_v3 = vld [vmem:[%s1477_s25 + $0x30] sm:$0xff] (%p186_p4) }
  0x16   : > { %411 = vst [vmem:[%s344_s26 + $0x10] sm:$0xff] %v410_v2  ;;  %v414_v4 = vld [vmem:[%s1477_s25 + $0x40] sm:$0xff]  ;;  %v416_v5 = vld [vmem:[%s1477_s25 + $0x50] sm:$0xff]  ;;  %413 = vst [vmem:[%s344_s26 + $0x18] sm:$0xff] %v412_v3 }
  0x17   : > { %415 = vst [vmem:[%s344_s26 + $0x20] sm:$0xff] %v414_v4  ;;  %417 = vst [vmem:[%s344_s26 + $0x28] sm:$0xff] %v416_v5  ;;  %v418_v6 = vld [vmem:[%s1477_s25 + $0x60] sm:$0xff]  ;;  %v420_v7 = vld [vmem:[%s1477_s25 + $0x70] sm:$0xff] }
  0x18   : > { %v422_v8 = vld [vmem:[%s1477_s25 + $0x80] sm:$0xff]  ;;  %419 = vst [vmem:[%s344_s26 + $0x30] sm:$0xff] %v418_v6  ;;  %421 = vst [vmem:[%s344_s26 + $0x38] sm:$0xff] %v420_v7  ;;  %v424_v9 = vld [vmem:[%s1477_s25 + $0x90] sm:$0xff] }
  0x19   : > { %423 = vst [vmem:[%s344_s26 + $0x40] sm:$0xff] %v422_v8  ;;  %v426_v10 = vld [vmem:[%s1477_s25 + $0xa0] sm:$0xff]  ;;  %v428_v11 = vld [vmem:[%s1477_s25 + $0xb0] sm:$0xff]  ;;  %425 = vst [vmem:[%s344_s26 + $0x48] sm:$0xff] %v424_v9 }
  0x1a   : > { %427 = vst [vmem:[%s344_s26 + $0x50] sm:$0xff] %v426_v10  ;;  %429 = vst [vmem:[%s344_s26 + $0x58] sm:$0xff] %v428_v11  ;;  %v430_v12 = vld [vmem:[%s1477_s25 + $0xc0] sm:$0xff]  ;;  %v432_v13 = vld [vmem:[%s1477_s25 + $0xd0] sm:$0xff] }
  0x1b   : > { %v434_v14 = vld [vmem:[%s1477_s25 + $0xe0] sm:$0xff]  ;;  %431 = vst [vmem:[%s344_s26 + $0x60] sm:$0xff] %v430_v12  ;;  %433 = vst [vmem:[%s344_s26 + $0x68] sm:$0xff] %v432_v13  ;;  %v436_v15 = vld [vmem:[%s1477_s25 + $0xf0] sm:$0xff] }
  0x1c   : > { %435 = vst [vmem:[%s344_s26 + $0x70] sm:$0xff] %v434_v14  ;;  %437 = vst [vmem:[%s344_s26 + $0x78] sm:$0xff] %v436_v15 }
  0x1d PF: > { %p1127_p7 = scmp.ge.s32.totalorder %s1362_s11, 1  ;;  %p442_p8 = scmp.lt.s32.totalorder %s1362_s11, 5 }
  0x1f   : > { %p443_p9 = pnand %p1127_p7, %p442_p8 }
  0x20   : > { %s449_s15 = sand.u32 (!%p443_p9), 1, %s1338_s27   ;;  %s506_s16 = ssub.s32 (!%p443_p9), 1, %s1350_s30 }
  0x21   : > { %446 = sbr.rel (%p443_p9) target bundleno = 1623 (0x657), region = 82  ;;  %s1128_s17 = sshll.u32 (!%p443_p9), %s449_s15, 7 }
  0x22   : > { %s507_s18 = smul.u32 (!%p443_p9), %s1346_s29, %s506_s16  ;;  %p543_p10 = scmp.eq.s32.totalorder (!%p443_p9), %s1350_s30, 0 }
  0x23   : > { %p544_p11 = scmp.eq.s32.totalorder (!%p443_p9), %s1346_s29, 0  ;;  %s1513_s16 = scalar_lea.vmem (!%p443_p9), [#allocation9], %s1128_s17 }
  0x24   : > { %s508_s20 = sadd.s32 (!%p443_p9), %s1350_s30, %s507_s18 }
  0x25   : > { %p511_p12 = scmp.lt.s32.totalorder (!%p443_p9), %s508_s20, 1  ;;  %s1130_s21 = sshll.u32 (!%p443_p9), %s508_s20, 4 }
  0x26   : > { %p524_p13 = scmp.lt.s32.totalorder %s1130_s21, 31  ;;  %p545_p0 = pnand %p544_p11, %p543_p10 }
  0x27   : > { %s1746_s20 = smov (!%p511_p12, %s508_s20), 1 }
  0x28   : > { %s1748_s21 = smov (!%p524_p13, %s1130_s21), 31  ;;  %s1129_s22 = sshll.u32 %s1746_s20, 3 }
  0x29   : > { %s1506_s25 = scalar_lea.vmem %s1722_s0, %s1129_s22  ;;  %s1143_s26 = sshll.u32 %s1748_s21, 4 }
  0x2a   : > { %s1511_s15 = scalar_lea.vmem %s1723_s1, %s1143_s26  ;;  %548 = sbr.rel (%p545_p0) target bundleno = 50 (0x32), region = 90 }
  0x2f   : > { %vm551_vm0 = vcmask 7168   ;;  %v1364_v16 = vmov 0.0  }
  0x30   : > { %549 = vst [vmem:[#allocation2] sm:$0xff] %v1364_v16  ;;  %550 = vst [vmem:[#allocation2 + $0x8] sm:$0xff] %v1364_v16 }
  0x31   : > { %552 = vst.msk [vmem:[#allocation8] sm:$0xff] %vm551_vm0, %v1364_v16 }
  0x32 PF: > { %p1133_p1 = scmp.ne.s32.totalorder %s1350_s30, 0 }
  0x34   : > { %555 = sbr.rel (%p1133_p1) target bundleno = 288 (0x120), region = 94 }
  0x39   : > { %v590_v17 = vld [vmem:[%s1511_s15 + $0xf8] sm:$0xff]  ;;  %v589_v18 = vld [vmem:[%s1511_s15 + $0xf0] sm:$0xff]  ;;  %v588_v19 = vld [vmem:[%s1511_s15 + $0xe8] sm:$0xff]  ;;  %v1365_v21 = vmov 0.0   ;;  %vm670_vm1 = vcmask 7168  }
  0x3a   : > { %591 = vmatprep.subr.mxu0 %v590_v17  ;;  %v587_v20 = vld [vmem:[%s1511_s15 + $0xe0] sm:$0xff]  ;;  %655 = vmatprep.mubr.f32.mxu0 %v1365_v21  ;;  %v586_v22 = vld [vmem:[%s1511_s15 + $0xd8] sm:$0xff]  ;;  %v585_v23 = vld [vmem:[%s1511_s15 + $0xd0] sm:$0xff] }
  0x3b   : > { %592 = vmatpush1.msra.mxu0 %v589_v18  ;;  %v584_v24 = vld [vmem:[%s1511_s15 + $0xc8] sm:$0xff]  ;;  %v583_v25 = vld [vmem:[%s1511_s15 + $0xc0] sm:$0xff]  ;;  %v582_v26 = vld [vmem:[%s1511_s15 + $0xb8] sm:$0xff] }
  0x3c   : > { %593 = vmatprep.subr.mxu0 %v588_v19  ;;  %v581_v27 = vld [vmem:[%s1511_s15 + $0xb0] sm:$0xff]  ;;  %v580_v28 = vld [vmem:[%s1511_s15 + $0xa8] sm:$0xff]  ;;  %v579_v29 = vld [vmem:[%s1511_s15 + $0xa0] sm:$0xff] }
  0x3d   : > { %594 = vmatpush1.msra.mxu0 %v587_v20  ;;  %v578_v30 = vld [vmem:[%s1511_s15 + $0x98] sm:$0xff]  ;;  %v556_v31 = vld [vmem:[%s1506_s25] sm:$0xff]  ;;  %v577_v32 = vld [vmem:[%s1511_s15 + $0x90] sm:$0xff] }
  0x3e   : > { %595 = vmatprep.subr.mxu0 %v586_v22  ;;  %667 = vadd.xlane.f32.xlu0 %v556_v31  ;;  %v576_v33 = vld [vmem:[%s1511_s15 + $0x88] sm:$0xff]  ;;  %v575_v34 = vld [vmem:[%s1511_s15 + $0x80] sm:$0xff]  ;;  %v574_v35 = vld [vmem:[%s1511_s15 + $0x78] sm:$0xff] }
  0x3f   : > { %596 = vmatpush1.msra.mxu0 %v585_v23  ;;  %v573_v36 = vld [vmem:[%s1511_s15 + $0x70] sm:$0xff]  ;;  %v572_v37 = vld [vmem:[%s1511_s15 + $0x68] sm:$0xff]  ;;  %v571_v38 = vld [vmem:[%s1511_s15 + $0x60] sm:$0xff] }
  0x40   : > { %597 = vmatprep.subr.mxu0 %v584_v24  ;;  %v570_v39 = vld [vmem:[%s1511_s15 + $0x58] sm:$0xff]  ;;  %v569_v40 = vld [vmem:[%s1511_s15 + $0x50] sm:$0xff]  ;;  %v568_v41 = vld [vmem:[%s1511_s15 + $0x48] sm:$0xff] }
  0x41   : > { %598 = vmatpush1.msra.mxu0 %v583_v25  ;;  %v567_v42 = vld [vmem:[%s1511_s15 + $0x40] sm:$0xff]  ;;  %v566_v43 = vld [vmem:[%s1511_s15 + $0x38] sm:$0xff]  ;;  %v565_v44 = vld [vmem:[%s1511_s15 + $0x30] sm:$0xff] }
  0x42   : > { %599 = vmatprep.subr.mxu0 %v582_v26  ;;  %v564_v45 = vld [vmem:[%s1511_s15 + $0x28] sm:$0xff]  ;;  %v563_v46 = vld [vmem:[%s1511_s15 + $0x20] sm:$0xff]  ;;  %v562_v47 = vld [vmem:[%s1511_s15 + $0x18] sm:$0xff] }
  0x43   : > { %600 = vmatpush1.msra.mxu0 %v581_v27  ;;  %v561_v48 = vld [vmem:[%s1511_s15 + $0x10] sm:$0xff]  ;;  %v560_v49 = vld [vmem:[%s1511_s15 + $0x8] sm:$0xff]  ;;  %v559_v50 = vld [vmem:[%s1511_s15] sm:$0xff] }
  0x44   : > { %601 = vmatprep.subr.mxu0 %v580_v28  ;;  %v666_v51 = vld [vmem:[#allocation8] sm:$0xff]  ;;  %v557_v54 = vld [vmem:[#allocation2] sm:$0xff]  ;;  %v558_v56 = vld [vmem:[#allocation2 + $0x8] sm:$0xff] }
  0x45   : > { %602 = vmatpush1.msra.mxu0 %v579_v29 }
  0x46   : > { %603 = vmatprep.subr.mxu0 %v578_v30 }
  0x47   : > { %604 = vmatpush1.msra.mxu0 %v577_v32 }
  0x48   : > { %605 = vmatprep.subr.mxu0 %v576_v33 }
  0x49   : > { %606 = vmatpush1.msra.mxu0 %v575_v34 }
  0x4a   : > { %607 = vmatprep.subr.mxu0 %v574_v35 }
  0x4b   : > { %608 = vmatpush1.msra.mxu0 %v573_v36 }
  0x4c   : > { %609 = vmatprep.subr.mxu0 %v572_v37 }
  0x4d   : > { %610 = vmatpush1.msra.mxu0 %v571_v38 }
  0x4e   : > { %611 = vmatprep.subr.mxu0 %v570_v39 }
  0x4f   : > { %612 = vmatpush1.msra.mxu0 %v569_v40 }
  0x50   : > { %613 = vmatprep.subr.mxu0 %v568_v41 }
  0x51   : > { %614 = vmatpush1.msra.mxu0 %v567_v42 }
  0x52   : > { %615 = vmatprep.subr.mxu0 %v566_v43 }
  0x53   : > { %616 = vmatpush1.msra.mxu0 %v565_v44 }
  0x54   : > { %617 = vmatprep.subr.mxu0 %v564_v45 }
  0x55   : > { %618 = vmatpush1.msra.mxu0 %v563_v46 }
  0x56   : > { %619 = vmatprep.subr.mxu0 %v562_v47 }
  0x57   : > { %620 = vmatpush1.msra.mxu0 %v561_v48 }
  0x58   : > { %621 = vmatprep.subr.mxu0 %v560_v49 }
  0x59   : > { %622 = vmatpush1.msra.mxu0 %v559_v50 }
  0x5a   : > { %656 = vmatmul.mubr.f32.vlgmr.msra.gmra.mxu0 %v556_v31 }
  0xc7   : > { %v668_v52 = vpop.xlane.xlu0 %667 }
  0xc8   : > { %v669_v53 = vadd.f32 %v668_v52, %v666_v51 }
  0xca   : > { %671 = vst.msk [vmem:[#allocation8] sm:$0xff] %vm670_vm1, %v669_v53 }
 0x11a   : > { %v657_v55 = vpop.f32.mrf.mxu0 }
 0x11b   : > { %v662_v57 = vadd.f32 %v657_v55, %v557_v54 }
 0x11c   : > { %v659_v58 = vpop.f32.mrf.mxu0 }
 0x11d   : > { %664 = vst [vmem:[#allocation2] sm:$0xff] %v662_v57  ;;  %v663_v59 = vadd.f32 %v659_v58, %v558_v56 }
 0x11f   : > { %665 = vst [vmem:[#allocation2 + $0x8] sm:$0xff] %v663_v59 }
 0x120 PF: > { %p1134_p2 = scmp.ne.s32.totalorder %s1350_s30, 1 }
 0x121   : > { %p1135_p3 = scmp.ne.s32.totalorder (!%p1134_p2), %s1346_s29, 0 }
 0x122   : > { %675 = sbr.rel (%p1134_p2) target bundleno = 1608 (0x648), region = 98 }
 0x127   : > { %678 = sbr.rel (%p1135_p3) target bundleno = 691 (0x2b3), region = 102 }
 0x12c   : > { %v722_v60 = vld [vmem:[%s1725_s3 + $0xf8] sm:$0xff]  ;;  %v721_v61 = vld [vmem:[%s1725_s3 + $0xf0] sm:$0xff]  ;;  %v720_v62 = vld [vmem:[%s1725_s3 + $0xe8] sm:$0xff]  ;;  %vm816_vm2 = vcmask 7168   ;;  %v1366_v0 = vmov 0.0   ;;  %v725_v35 = vlaneseq }
 0x12d   : > { %735 = vmatprep.subr.mxu0 %v722_v60  ;;  %v719_v63 = vld [vmem:[%s1725_s3 + $0xe0] sm:$0xff]  ;;  %799 = vmatprep.mubr.f32.mxu0 %v1366_v0  ;;  %827 = vst.msk [vmem:[#allocation7] sm:$0xff] %vm816_vm2, %v1366_v0  ;;  %v718_v1 = vld [vmem:[%s1725_s3 + $0xd8] sm:$0xff]  ;;  %v1367_v2 = vmov -1e+30   ;;  %v717_v3 = vld [vmem:[%s1725_s3 + $0xd0] sm:$0xff] }
 0x12e   : > { %736 = vmatpush1.msra.mxu0 %v721_v61  ;;  %826 = vst.msk [vmem:[#allocation6] sm:$0xff] %vm816_vm2, %v1367_v2  ;;  %v716_v4 = vld [vmem:[%s1725_s3 + $0xc8] sm:$0xff]  ;;  %v715_v5 = vld [vmem:[%s1725_s3 + $0xc0] sm:$0xff]  ;;  %v714_v6 = vld [vmem:[%s1725_s3 + $0xb8] sm:$0xff]  ;;  %v726_v36 = vshrl.u32 %v725_v35, 7 }
 0x12f   : > { %737 = vmatprep.subr.mxu0 %v720_v62  ;;  %v713_v7 = vld [vmem:[%s1725_s3 + $0xb0] sm:$0xff]  ;;  %v712_v8 = vld [vmem:[%s1725_s3 + $0xa8] sm:$0xff]  ;;  %v711_v9 = vld [vmem:[%s1725_s3 + $0xa0] sm:$0xff] }
 0x130   : > { %738 = vmatpush1.msra.mxu0 %v719_v63  ;;  %v710_v10 = vld [vmem:[%s1725_s3 + $0x98] sm:$0xff]  ;;  %v709_v11 = vld [vmem:[%s1725_s3 + $0x90] sm:$0xff]  ;;  %v708_v12 = vld [vmem:[%s1725_s3 + $0x88] sm:$0xff]  ;;  %v731_v37 = vsub.s32 1, %v726_v36  ;;  %v727_v41 = vsub.s32 0, %v726_v36 }
 0x131   : > { %739 = vmatprep.subr.mxu0 %v718_v1  ;;  %v707_v13 = vld [vmem:[%s1725_s3 + $0x80] sm:$0xff]  ;;  %v706_v14 = vld [vmem:[%s1725_s3 + $0x78] sm:$0xff]  ;;  %v705_v15 = vld [vmem:[%s1725_s3 + $0x70] sm:$0xff] }
 0x132   : > { %740 = vmatpush1.msra.mxu0 %v717_v3  ;;  %v704_v16 = vld [vmem:[%s1725_s3 + $0x68] sm:$0xff]  ;;  %v703_v17 = vld [vmem:[%s1725_s3 + $0x60] sm:$0xff]  ;;  %v702_v18 = vld [vmem:[%s1725_s3 + $0x58] sm:$0xff] }
 0x133   : > { %741 = vmatprep.subr.mxu0 %v716_v4  ;;  %v701_v19 = vld [vmem:[%s1725_s3 + $0x50] sm:$0xff]  ;;  %v679_v20 = vld [vmem:[#allocation2] sm:$0xff]  ;;  %v700_v22 = vld [vmem:[%s1725_s3 + $0x48] sm:$0xff] }
 0x134   : > { %742 = vmatpush1.msra.mxu0 %v715_v5  ;;  %v1136_v21 = vld [vmem:[%s1724_s2] ss:$0 sm:$0xff]  ;;  %v698_v24 = vld [vmem:[%s1725_s3 + $0x38] sm:$0xff]  ;;  %v697_v26 = vld [vmem:[%s1725_s3 + $0x30] sm:$0xff] }
 0x135   : > { %743 = vmatprep.subr.mxu0 %v714_v6  ;;  %v699_v23 = vld [vmem:[%s1725_s3 + $0x40] sm:$0xff]  ;;  %v687_v25 = vadd.f32 %v1136_v21, %v679_v20  ;;  %v696_v27 = vld [vmem:[%s1725_s3 + $0x28] sm:$0xff]  ;;  %v694_v29 = vld [vmem:[%s1725_s3 + $0x18] sm:$0xff] }
 0x136   : > { %744 = vmatpush1.msra.mxu0 %v713_v7  ;;  %v695_v28 = vld [vmem:[%s1725_s3 + $0x20] sm:$0xff]  ;;  %v693_v31 = vld [vmem:[%s1725_s3 + $0x10] sm:$0xff]  ;;  %v692_v32 = vld [vmem:[%s1725_s3 + $0x8] sm:$0xff] }
 0x137   : > { %745 = vmatprep.subr.mxu0 %v712_v8  ;;  %v689_v30 = vmul.f32 0.01, %v687_v25  ;;  %vm688_vm3 = vcmp.gt.f32.partialorder %v687_v25, 0.0  ;;  %v691_v33 = vld [vmem:[%s1725_s3] sm:$0xff] }
 0x138   : > { %746 = vmatpush1.msra.mxu0 %v711_v9  ;;  %v723_v38 = vld [vmem:[%s1726_s4] sm:$0x3] }
 0x139   : > { %747 = vmatprep.subr.mxu0 %v710_v10  ;;  %v690_v34 = vsel %vm688_vm3, %v687_v25, %v689_v30  ;;  %v732_v39 = vrot.slane %v723_v38, %v731_v37  ;;  %v728_v44 = vrot.slane %v723_v38, %v727_v41  ;;  %v818_v51 = vld [vmem:[%s1728_s6] sm:$0xff] }
 0x13a   : > { %748 = vmatpush1.msra.mxu0 %v709_v11 }
 0x13b   : > { %749 = vmatprep.subr.mxu0 %v708_v12 }
 0x13c   : > { %750 = vmatpush1.msra.mxu0 %v707_v13 }
 0x13d   : > { %751 = vmatprep.subr.mxu0 %v706_v14 }
 0x13e   : > { %752 = vmatpush1.msra.mxu0 %v705_v15 }
 0x13f   : > { %753 = vmatprep.subr.mxu0 %v704_v16 }
 0x140   : > { %754 = vmatpush1.msra.mxu0 %v703_v17 }
 0x141   : > { %755 = vmatprep.subr.mxu0 %v702_v18 }
 0x142   : > { %756 = vmatpush1.msra.mxu0 %v701_v19 }
 0x143   : > { %757 = vmatprep.subr.mxu0 %v700_v22 }
 0x144   : > { %758 = vmatpush1.msra.mxu0 %v699_v23 }
 0x145   : > { %759 = vmatprep.subr.mxu0 %v698_v24 }
 0x146   : > { %760 = vmatpush1.msra.mxu0 %v697_v26 }
 0x147   : > { %761 = vmatprep.subr.mxu0 %v696_v27 }
 0x148   : > { %762 = vmatpush1.msra.mxu0 %v695_v28 }
 0x149   : > { %763 = vmatprep.subr.mxu0 %v694_v29 }
 0x14a   : > { %764 = vmatpush1.msra.mxu0 %v693_v31 }
 0x14b   : > { %765 = vmatprep.subr.mxu0 %v692_v32 }
 0x14c   : > { %766 = vmatpush1.msra.mxu0 %v691_v33 }
 0x14d   : > { %800 = vmatmul.mubr.f32.vlgmr.msra.gmra.mxu0 %v690_v34 }
 0x20d   : > { %v801_v40 = vpop.f32.mrf.mxu0 }
 0x20e   : > { %v802_v48 = vadd.f32 %v801_v40, %v728_v44 }
 0x20f   : > { %v803_v42 = vpop.f32.mrf.mxu0 }
 0x210   : > { %v804_v43 = vadd.f32 %v803_v42, %v732_v39  ;;  %v806_v49 = vmul.f32 %v802_v48, %v802_v48 }
 0x212   : > { %v808_v45 = vmul.f32 2.0, %v804_v43  ;;  %v819_v46 = vmul.f32 1.442695, %v804_v43  ;;  %v807_v50 = vsub.f32 1.0, %v806_v49 }
 0x214   : > { %v810_v47 = vmul.f32 1.442695, %v808_v45  ;;  %1267 = vpow2.f32 %v819_v46  ;;  %v809_v54 = vadd.f32 %v808_v45, %v807_v50 }
 0x216   : > { %1269 = vpow2.f32 %v810_v47 }
 0x221   : > { %v1268_v52 = vpop.eup %1267 }
 0x222   : > { %v821_v53 = vmul.f32 %v1268_v52, %v818_v51 }
 0x223   : > { %v1270_v55 = vpop.eup %1269 }
 0x224   : > { %v822_v56 = vadd.f32 %v821_v53, %v802_v48  ;;  %v812_v57 = vsub.f32 %v809_v54, %v1270_v55 }
 0x226   : > { %823 = vst [vmem:[#allocation3] sm:$0xff] %v822_v56  ;;  %824 = vst [vmem:[#allocation4] sm:$0xff] %v822_v56  ;;  %813 = vadd.xlane.f32.xlu0 %v812_v57 }
 0x227   : > { %825 = vst [vmem:[#allocation10] sm:$0xff] %v822_v56 }
 0x2af   : > { %v814_v58 = vpop.xlane.xlu0 %813 }
 0x2b0   : > { %v815_v59 = vmul.f32 -0.5, %v814_v58 }
 0x2b2   : > { %817 = vst.msk [vmem:[#allocation5] sm:$0xff] %vm816_vm2, %v815_v59 }
 0x2b3 PF: > { %v844_v60 = vld [vmem:[%s1513_s16 + $0x78] sm:$0xff]  ;;  %v1368_v61 = vmov 0.0   ;;  %v843_v62 = vld [vmem:[%s1513_s16 + $0x70] sm:$0xff]  ;;  %vm1369_vm4 = vmmov 0   ;;  %v842_v63 = vld [vmem:[%s1513_s16 + $0x68] sm:$0xff]  ;;  %v1370_v16 = vmov 0  }
 0x2b4   : > { %1161 = vmatprep.subr.mxu0 %v1368_v61  ;;  %1193 = vmatprep.mubr.msk.f32.mxu0 %vm1369_vm4, %v1368_v61  ;;  %v841_v0 = vld [vmem:[%s1513_s16 + $0x60] sm:$0xff]  ;;  %v840_v1 = vld [vmem:[%s1513_s16 + $0x58] sm:$0xff]  ;;  %v839_v2 = vld [vmem:[%s1513_s16 + $0x50] sm:$0xff]  ;;  %vm935_vm5 = vcmask 7168   ;;  %p1137_p4 = scmp.ne.s32.totalorder %s1346_s29, 1 }
 0x2b5   : > { %1162 = vmatpush3.msra.mxu0 %v844_v60  ;;  %v838_v3 = vld [vmem:[%s1513_s16 + $0x48] sm:$0xff]  ;;  %v837_v4 = vld [vmem:[%s1513_s16 + $0x40] sm:$0xff]  ;;  %v836_v5 = vld [vmem:[%s1513_s16 + $0x38] sm:$0xff]  ;;  %1271 = vset.pattern.permute.xlu0 %v1370_v16 }
 0x2b6   : > { %1163 = vmatprep.subr.mxu0 %v1368_v61  ;;  %v835_v6 = vld [vmem:[%s1513_s16 + $0x30] sm:$0xff]  ;;  %v834_v7 = vld [vmem:[%s1513_s16 + $0x28] sm:$0xff]  ;;  %v833_v8 = vld [vmem:[%s1513_s16 + $0x20] sm:$0xff] }
 0x2b7   : > { %1164 = vmatpush3.msra.mxu0 %v843_v62  ;;  %v832_v9 = vld [vmem:[%s1513_s16 + $0x18] sm:$0xff]  ;;  %v831_v10 = vld [vmem:[%s1513_s16 + $0x10] sm:$0xff]  ;;  %v830_v11 = vld [vmem:[%s1513_s16 + $0x8] sm:$0xff] }
 0x2b8   : > { %1165 = vmatprep.subr.mxu0 %v1368_v61  ;;  %v829_v12 = vld [vmem:[%s1513_s16] sm:$0xff]  ;;  %v828_v13 = vld [vmem:[#allocation4] sm:$0xff]  ;;  %v915_v17 = vld [vmem:[#allocation6] sm:$0xff] }
 0x2b9   : > { %1166 = vmatpush3.msra.mxu0 %v842_v63  ;;  %v922_v27 = vld [vmem:[#allocation7] sm:$0xff] }
 0x2ba   : > { %1167 = vmatprep.subr.mxu0 %v1368_v61 }
 0x2bb   : > { %1168 = vmatpush3.msra.mxu0 %v841_v0 }
 0x2bc   : > { %1169 = vmatprep.subr.mxu0 %v1368_v61 }
 0x2bd   : > { %1170 = vmatpush3.msra.mxu0 %v840_v1 }
 0x2be   : > { %1171 = vmatprep.subr.mxu0 %v1368_v61 }
 0x2bf   : > { %1172 = vmatpush3.msra.mxu0 %v839_v2 }
 0x2c0   : > { %1173 = vmatprep.subr.mxu0 %v1368_v61 }
 0x2c1   : > { %1174 = vmatpush3.msra.mxu0 %v838_v3 }
 0x2c2   : > { %1175 = vmatprep.subr.mxu0 %v1368_v61 }
 0x2c3   : > { %1176 = vmatpush3.msra.mxu0 %v837_v4 }
 0x2c4   : > { %1177 = vmatprep.subr.mxu0 %v1368_v61 }
 0x2c5   : > { %1178 = vmatpush3.msra.mxu0 %v836_v5 }
 0x2c6   : > { %1179 = vmatprep.subr.mxu0 %v1368_v61 }
 0x2c7   : > { %1180 = vmatpush3.msra.mxu0 %v835_v6 }
 0x2c8   : > { %1181 = vmatprep.subr.mxu0 %v1368_v61 }
 0x2c9   : > { %1182 = vmatpush3.msra.mxu0 %v834_v7 }
 0x2ca   : > { %1183 = vmatprep.subr.mxu0 %v1368_v61 }
 0x2cb   : > { %1184 = vmatpush3.msra.mxu0 %v833_v8 }
 0x2cc   : > { %1185 = vmatprep.subr.mxu0 %v1368_v61 }
 0x2cd   : > { %1186 = vmatpush3.msra.mxu0 %v832_v9 }
 0x2ce   : > { %1187 = vmatprep.subr.mxu0 %v1368_v61 }
 0x2cf   : > { %1188 = vmatpush3.msra.mxu0 %v831_v10 }
 0x2d0   : > { %1189 = vmatprep.subr.mxu0 %v1368_v61 }
 0x2d1   : > { %1190 = vmatpush3.msra.mxu0 %v830_v11 }
 0x2d2   : > { %1191 = vmatprep.subr.mxu0 %v1368_v61 }
 0x2d3   : > { %1192 = vmatpush3.msra.mxu0 %v829_v12 }
 0x2d4   : > { %1194 = vmatmul.mubr.f32.vlgmr.msra.gmra.mxu0 %v828_v13 }
 0x394   : > { %v911_v14 = vpop.f32.mrf.mxu0 }
 0x395   : > { %916 = vmax.xlane.f32.xlu0 %v911_v14 }
 0x396   : > { %v1195_v15 = vpop.f32.mrf.mxu0 }
 0x41e   : > { %v917_v18 = vpop.xlane.xlu0 %916 }
 0x41f   : > { %v918_v19 = vmax.f32 %v915_v17, %v917_v18 }
 0x421   : > { %v919_v20 = vsub.f32 %v915_v17, %v918_v19  ;;  %937 = vst.msk [vmem:[#allocation6] sm:$0xff] %vm935_vm5, %v918_v19  ;;  %926 = vperm.xlu0 %1271, %v918_v19  }
 0x423   : > { %v920_v25 = vmul.f32 1.442695, %v919_v20 }
 0x49c   : > { %v927_v21 = vpop.permute.xlu0 %926 }
 0x49d   : > { %v929_v22 = vsub.f32 %v911_v14, %v927_v21 }
 0x49f   : > { %v930_v23 = vmul.f32 1.442695, %v929_v22 }
 0x4a1   : > { %1272 = vpow2.f32 %v930_v23 }
 0x4a2   : > { %1274 = vpow2.f32 %v920_v25 }
 0x4ae   : > { %v1273_v24 = vpop.eup %1272 }
 0x4af   : > { %932 = vadd.xlane.f32.xlu1 %v1273_v24  ;;  %v1275_v26 = vpop.eup %1274 }
 0x4b0   : > { %v923_v28 = vmul.f32 %v1275_v26, %v922_v27 }
 0x537   : > { %941 = sbr.rel (%p1137_p4) target bundleno = 1608 (0x648), region = 106 }
 0x538   : > { %v933_v29 = vpop.xlane.xlu1 %932 }
 0x539   : > { %v934_v30 = vadd.f32 %v933_v29, %v923_v28 }
 0x53b   : > { %936 = vst.msk [vmem:[#allocation7] sm:$0xff] %vm935_vm5, %v934_v30 }
 0x53c   : > { %v947_v31 = vld [vmem:[#allocation3] sm:$0xff]  ;;  %v948_v32 = vld [vmem:[#allocation2 + $0x8] sm:$0xff]  ;;  %v955_v34 = vld [vmem:[#allocation5] sm:$0xff]  ;;  %v1371_v35 = vmov 0  }
 0x53d   : > { %v949_v33 = vmul.f32 %v948_v32, %v947_v31  ;;  %1277 = vset.pattern.permute.xlu1 %v1371_v35  ;;  %1276 = vset.pattern.permute.xlu0 %v1371_v35  ;;  %v942_v39 = vld [vmem:[#allocation6] sm:$0xff]  ;;  %v952_v41 = vld [vmem:[#allocation8] sm:$0xff] }
 0x53e   : > { %968 = vperm.xlu1 %1277, %v955_v34  }
 0x53f   : > { %950 = vadd.xlane.f32.xlu0 %v949_v33 }
 0x542   : > { %v943_v36 = vld [vmem:[#allocation7] sm:$0xff] }
 0x543   : > { %1278 = vlog2.f32 %v943_v36 }
 0x550   : > { %v1279_v37 = vpop.eup %1278 }
 0x551   : > { %v945_v38 = vmul.f32 0.6931472, %v1279_v37 }
 0x553   : > { %v946_v40 = vadd.f32 %v945_v38, %v942_v39 }
 0x555   : > { %v953_v42 = vmul.f32 %v952_v41, %v946_v40 }
 0x5b9   : > { %v969_v43 = vpop.permute.xlu1 %968 }
 0x5ba   : > { %974 = vst [vmem:[%s1730_s8 + $0x8] sm:$0xff] %v969_v43 }
 0x5c8   : > { %v951_v44 = vpop.xlane.xlu0 %950 }
 0x5c9   : > { %v954_v45 = vsub.f32 %v953_v42, %v951_v44 }
 0x5cb   : > { %963 = vperm.xlu0 %1276, %v954_v45  }
 0x646   : > { %v964_v46 = vpop.permute.xlu0 %963 }
 0x647   : > { %973 = vst [vmem:[%s1730_s8] sm:$0xff] %v964_v46 }
 0x648 PF: > { %s1731_s30 = sadd.s32 4294967295, %s1362_s11   ;;  %s1372_s25 = smov [#allocation10]  }
 0x649   : > { %p1686_p5 = scmp.eq.s32.totalorder %s1731_s30, 3  ;;  %s989_s26 = sshll.u32 %s1372_s25, 4  ;;  %s990_s26 = int_to_ptr.vmem [resolvable:$true] %s989_s26 }
 0x64a   : > { %s1280_s27 = scalar_lea.vmem %s990_s26, 128  ;;  %p1287_p9 = scmp.lt.s32.totalorder %s990_s26, %s990_s26 }
 0x64b   : > { %p1281_p6 = scmp.ne.s32.totalorder %s990_s26, %s1280_s27  ;;  %p1288_p10 = scmp.lt.s32.totalorder %s1280_s27, %s1280_s27 }
 0x64d   : > { %p1282_p7 = pnand %p1281_p6, %p1686_p5  ;;  %p1289_p11 = por %p1288_p10, %p1287_p9 }
 0x64f   : > { %p1283_p8 = pneg %p1282_p7 }
 0x651   : > { %p1290_p12 = pnand %p1289_p11, %p1283_p8 }
 0x653   : > { %1293 = shalt.err (!%p1290_p12)
}
 0x654   : > { %1197 = dma.vmem_to_hbm [thread:$0]  (%p1686_p5), %s990_s26, 128, %s1729_s7, [#allocation11]  }
 0x655   : > { %1333 = dma.done.wait (%p1686_p5), [#allocation11], 128  }
 0x656   : > { %1335 = vsyncadd (%p1686_p5), [#allocation11], 4294967168 }
 0x657 PF: > { %s20_s11 = sadd.s32 1, %s1362_s11   ;;  %s1733_s27 = smov %s1342_s28 }
 0x658   : > { %p17_p13 = scmp.ge.s32.totalorder %s20_s11, 6   ;;  %s1734_s28 = smov %s1470_s19 }
 0x659   : > { %s1735_s29 = smov %s1354_s9  ;;  %s1736_s30 = smov %s1358_s10 }
 0x65a   : > { %s1737_s9 = smov %s1740_s13  ;;  %s1738_s10 = smov %s1744_s14 }
 0x65b   :  { %19 = sbr.rel (!%p17_p13) target bundleno = 4 (0x4), region = 160 }
 0x660   :  { %1013 = vsyncpa [#allocation11], 1 }
 0x661   :  { %1015 = vsyncpa [#allocation11 + $0x1], 1 }

</bundles_post_ra>
